<compile_context>
chip_gen: v7x
topology: tpu7x:2x2x1
jax: 0.10.0
libtpu: 0.0.40
codegen_flags: <defaults>
</compile_context>

<pallas_src>
import functools

import jax
import jax.numpy as jnp
from jax.experimental import pallas as pl
from jax.experimental.pallas import tpu as pltpu


# --------------------------------------------------------------------------
# Pallas kernel: fully fused MLP (all Linears + ReLUs + optional sigmoid)
# --------------------------------------------------------------------------

def _round_up(x, m):
    return (x + m - 1) // m * m


def _fused_mlp_kernel(x_ref, *refs, num_layers, sigmoid_output):
    """refs = (w0, b0, w1, b1, ..., w_{L-1}, b_{L-1}, o_ref).

    h = x; for i: h = relu(h @ w_i + b_i) (no relu on last layer); optional
    sigmoid.  MXU operands bf16, accumulation + VPU/EUP work in f32.
    Intermediates never leave vregs/VMEM.
    """
    o_ref = refs[-1]
    h = x_ref[...].astype(jnp.float32)
    for i in range(num_layers):
        w = refs[2 * i][...]                       # bf16 (Kp, Np)
        b = refs[2 * i + 1][...]                   # f32  (1, Np)
        acc = jnp.dot(h.astype(jnp.bfloat16), w,
                      preferred_element_type=jnp.float32)   # MXU, f32 acc
        h = acc + b
        if i < num_layers - 1:
            h = jnp.maximum(h, 0.0)                # ReLU (VPU, f32)
    if sigmoid_output:
        h = jax.nn.sigmoid(h)                      # EUP, f32
    o_ref[...] = h.astype(o_ref.dtype)


# --------------------------------------------------------------------------
# One-time parameter preparation (hoisted out of the forward path)
# --------------------------------------------------------------------------

def prepare_mlp_params(params):
    """Cast/pad parameters once.

    params: list of (w, b) with w:(K_i, N_i) (torch weight transposed), b:(N_i,).
    Hidden dims are padded to multiples of 128 (lane-dense intermediates,
    aligned MXU contraction); the first K and last N keep their true sizes.
    Weights -> bf16, biases -> f32 (1, Np).
    """
    num_layers = len(params)
    in_dim = params[0][0].shape[0]
    out_dim = params[-1][0].shape[1]

    k_dims = [in_dim]
    n_dims = []
    for li, (w, _b) in enumerate(params):
        n = w.shape[1]
        np_ = n if li == num_layers - 1 else _round_up(n, 128)
        n_dims.append(np_)
        k_dims.append(np_)
    k_dims = k_dims[:-1]

    flat = []
    for li, (w, b) in enumerate(params):
        k, n = w.shape
        kp, np_ = k_dims[li], n_dims[li]
        w_p = jnp.pad(w.astype(jnp.bfloat16), ((0, kp - k), (0, np_ - n)))
        b_p = jnp.pad(b.astype(jnp.float32), (0, np_ - n)).reshape(1, np_)
        flat.extend([w_p, b_p])

    meta = dict(num_layers=num_layers, in_dim=in_dim, out_dim=out_dim,
                k_dims=tuple(k_dims), n_dims=tuple(n_dims))
    return flat, meta


# --------------------------------------------------------------------------
# Forward wrapper
# --------------------------------------------------------------------------

def pallas_mlp_forward(prepped, x, *, sigmoid_output=False, tile_m=512):
    """Fused-MLP forward.  `prepped` comes from prepare_mlp_params."""
    flat_params, meta = prepped
    num_layers = meta["num_layers"]
    in_dim, out_dim = meta["in_dim"], meta["out_dim"]
    k_dims, n_dims = meta["k_dims"], meta["n_dims"]

    assert x.shape[-1] == in_dim
    lead_shape = x.shape[:-1]
    x2 = x.reshape(-1, in_dim)
    M = x2.shape[0]
    x_itemsize = x2.dtype.itemsize

    # ---- generation-aware VMEM budget -----------------------------------
    try:
        vmem_phys = pltpu.get_tpu_info().vmem_capacity_bytes
    except Exception:
        vmem_phys = 64 << 20                      # v7x per-TC minimum
    vmem_budget = int(vmem_phys * 0.75)

    w_bytes = sum(k * n * 2 for k, n in zip(k_dims, n_dims))   # bf16, single-buffered
    b_bytes = sum(n * 4 for n in n_dims)
    max_n = max(n_dims)

    def vmem_estimate(tm):
        x_io = 2 * tm * in_dim * x_itemsize        # double-buffered input tile
        o_io = 2 * tm * out_dim * 4                # double-buffered output tile
        act = 3 * tm * max_n * 4                   # live f32 h + bf16 copies, slack
        return x_io + o_io + w_bytes + b_bytes + act

    # ---- pick row tile (multiple of 16 for bf16 sublane packing) --------
    TM = max(16, min(_round_up(tile_m, 16), _round_up(M, 16)))
    while TM > 16 and vmem_estimate(TM) > vmem_budget:
        TM = max(16, _round_up(TM // 2, 16))

    # Pad only the ragged row remainder (no-op when M % TM == 0).
    m_pad = _round_up(M, TM)
    x_p = x2 if m_pad == M else jnp.pad(x2, ((0, m_pad - M), (0, 0)))
    grid = (m_pad // TM,)

    vmem_limit = int(min(vmem_budget, max(2 * vmem_estimate(TM), 32 << 20)))

    cost = pl.CostEstimate(
        flops=2 * m_pad * sum(k * n for k, n in zip(k_dims, n_dims)),
        transcendentals=(m_pad * out_dim) if sigmoid_output else 0,
        bytes_accessed=(m_pad * in_dim * x_itemsize
                        + m_pad * out_dim * 4 + w_bytes + b_bytes),
    )

    def run(weight_mode):
        in_specs = [pl.BlockSpec((TM, in_dim), lambda i: (i, 0))]
        for kp, np_ in zip(k_dims, n_dims):
            # Constant index_map -> parameters stay resident across grid steps.
            in_specs.append(pl.BlockSpec((kp, np_), lambda i: (0, 0),
                                         pipeline_mode=weight_mode))
            in_specs.append(pl.BlockSpec((1, np_), lambda i: (0, 0),
                                         pipeline_mode=weight_mode))
        out_spec = pl.BlockSpec((TM, out_dim), lambda i: (i, 0))
        return pl.pallas_call(
            functools.partial(_fused_mlp_kernel,
                              num_layers=num_layers,
                              sigmoid_output=sigmoid_output),
            out_shape=jax.ShapeDtypeStruct((m_pad, out_dim), jnp.float32),
            grid=grid,
            in_specs=in_specs,
            out_specs=out_spec,
            compiler_params=pltpu.CompilerParams(
                dimension_semantics=("parallel",),
                vmem_limit_bytes=vmem_limit),
            cost_estimate=cost,
        )(x_p, *flat_params)

    try:
        out = run(pl.Buffered(1))      # single-buffer the constant-index params
    except Exception:
        out = run(None)                # fallback: default double-buffering

    if m_pad != M:
        out = out[:M]
    return out.reshape(lead_shape + (out_dim,))


# --------------------------------------------------------------------------
# Parameter construction + pure-JAX reference
# --------------------------------------------------------------------------

def init_mlp_params(key, input_dim, hidden_dim, output_dim, num_layers):
    """Matches the torch MLP layer structure; weights stored as (in, out)."""
    dims_in = [input_dim] + [hidden_dim] * (num_layers - 1)
    dims_out = [hidden_dim] * (num_layers - 1) + [output_dim]
    params = []
    keys = jax.random.split(key, num_layers)
    for k, din, dout in zip(keys, dims_in, dims_out):
        kw, kb = jax.random.split(k)
        bound = 1.0 / (din ** 0.5)
        w = jax.random.uniform(kw, (din, dout), jnp.float32, -bound, bound)
        b = jax.random.uniform(kb, (dout,), jnp.float32, -bound, bound)
        params.append((w, b))
    return params


def mlp_reference(params, x, sigmoid_output=False):
    h = x.astype(jnp.float32)
    n = len(params)
    for i, (w, b) in enumerate(params):
        h = h @ w + b
        if i < n - 1:
            h = jax.nn.relu(h)
    if sigmoid_output:
        h = jax.nn.sigmoid(h)
    return h


# --------------------------------------------------------------------------
# Main
# --------------------------------------------------------------------------

if __name__ == "__main__":
    key = jax.random.PRNGKey(0)
    k_hyper, k_iou, k_x = jax.random.split(key, 3)

    B, T, D = 2, 8, 32        # batch, tokens, transformer_dim (small shapes)
    HIDDEN = 64

    x = jax.random.normal(k_x, (B, T, D), jnp.float32)

    # (a) hyper-network style head: D -> HIDDEN -> D, 3 layers, no sigmoid
    hyper_params = init_mlp_params(k_hyper, D, HIDDEN, D, num_layers=3)
    hyper_prepped = prepare_mlp_params(hyper_params)      # one-time prep
    y_hyper = pallas_mlp_forward(hyper_prepped, x, sigmoid_output=False)

    # (b) IoU-head style: D -> HIDDEN -> 4, 3 layers, sigmoid_output=True
    iou_params = init_mlp_params(k_iou, D, HIDDEN, 4, num_layers=3)
    iou_prepped = prepare_mlp_params(iou_params)           # one-time prep
    y_iou = pallas_mlp_forward(iou_prepped, x[:, 0, :], sigmoid_output=True)

    jax.block_until_ready((y_hyper, y_iou))

    # correctness vs pure-JAX f32 reference (bf16 MXU operands -> loose tol)
    ref_hyper = mlp_reference(hyper_params, x)
    ref_iou = mlp_reference(iou_params, x[:, 0, :], sigmoid_output=True)

    assert y_hyper.shape == (B, T, D)
    assert y_iou.shape == (B, 4)
    assert jnp.allclose(y_hyper, ref_hyper, atol=3e-2, rtol=3e-2)
    assert jnp.allclose(y_iou, ref_iou, atol=3e-2, rtol=3e-2)

    print("KERNEL_OK")
</pallas_src>

<mosaic_0001>
module attributes {stable_mosaic.version = 11 : i64} {
  func.func @_fused_mlp_kernel(%arg0: i32, %arg1: memref<16x32xf32, #tpu.memory_space<vmem>>, %arg2: memref<32x128xbf16, #tpu.memory_space<vmem>>, %arg3: memref<1x128xf32, #tpu.memory_space<vmem>>, %arg4: memref<128x128xbf16, #tpu.memory_space<vmem>>, %arg5: memref<1x128xf32, #tpu.memory_space<vmem>>, %arg6: memref<128x32xbf16, #tpu.memory_space<vmem>>, %arg7: memref<1x32xf32, #tpu.memory_space<vmem>>, %arg8: memref<16x32xf32, #tpu.memory_space<vmem>>) attributes {dimension_semantics = [#tpu.dimension_semantics<parallel>], iteration_bounds = array<i64: 1>, scalar_prefetch = 0 : i64, scratch_operands = 0 : i64, tpu.core_type = #tpu.core_type<tc>, window_params = [{transform_indices = @transform_0, window_bounds = array<i64: 16, 32>}, {pipeline_mode = #tpu.pipeline_mode<synchronous>, transform_indices = @transform_1, window_bounds = array<i64: 32, 128>}, {pipeline_mode = #tpu.pipeline_mode<synchronous>, transform_indices = @transform_2, window_bounds = array<i64: 1, 128>}, {pipeline_mode = #tpu.pipeline_mode<synchronous>, transform_indices = @transform_3, window_bounds = array<i64: 128, 128>}, {pipeline_mode = #tpu.pipeline_mode<synchronous>, transform_indices = @transform_4, window_bounds = array<i64: 1, 128>}, {pipeline_mode = #tpu.pipeline_mode<synchronous>, transform_indices = @transform_5, window_bounds = array<i64: 128, 32>}, {pipeline_mode = #tpu.pipeline_mode<synchronous>, transform_indices = @transform_6, window_bounds = array<i64: 1, 32>}, {transform_indices = @transform_7, window_bounds = array<i64: 16, 32>}]} {
    %c0 = arith.constant 0 : index
    %c0_0 = arith.constant 0 : index
    %0 = vector.load %arg1[%c0, %c0_0] : memref<16x32xf32, #tpu.memory_space<vmem>>, vector<16x32xf32>
    %c0_1 = arith.constant 0 : index
    %c0_2 = arith.constant 0 : index
    %1 = vector.load %arg2[%c0_1, %c0_2] : memref<32x128xbf16, #tpu.memory_space<vmem>>, vector<32x128xbf16>
    %c0_3 = arith.constant 0 : index
    %c0_4 = arith.constant 0 : index
    %2 = vector.load %arg3[%c0_3, %c0_4] : memref<1x128xf32, #tpu.memory_space<vmem>>, vector<1x128xf32>
    %3 = arith.truncf %0 : vector<16x32xf32> to vector<16x32xbf16>
    %cst = arith.constant dense<0.000000e+00> : vector<16x128xf32>
    %4 = tpu.matmul %3, %1, %cst {dimension_numbers = #tpu.dot_dimension_numbers<[1], [0], [0], [1], [0, 0, 1, 1], [], []>} : vector<16x32xbf16>, vector<32x128xbf16>, vector<16x128xf32> -> vector<16x128xf32>
    %5 = vector.broadcast %2 : vector<1x128xf32> to vector<16x128xf32>
    %6 = arith.addf %4, %5 : vector<16x128xf32>
    %cst_5 = arith.constant 0.000000e+00 : f32
    %7 = vector.broadcast %cst_5 : f32 to vector<16x128xf32>
    %8 = arith.maximumf %6, %7 : vector<16x128xf32>
    %c0_6 = arith.constant 0 : index
    %c0_7 = arith.constant 0 : index
    %9 = vector.load %arg4[%c0_6, %c0_7] : memref<128x128xbf16, #tpu.memory_space<vmem>>, vector<128x128xbf16>
    %c0_8 = arith.constant 0 : index
    %c0_9 = arith.constant 0 : index
    %10 = vector.load %arg5[%c0_8, %c0_9] : memref<1x128xf32, #tpu.memory_space<vmem>>, vector<1x128xf32>
    %11 = arith.truncf %8 : vector<16x128xf32> to vector<16x128xbf16>
    %cst_10 = arith.constant dense<0.000000e+00> : vector<16x128xf32>
    %12 = tpu.matmul %11, %9, %cst_10 {dimension_numbers = #tpu.dot_dimension_numbers<[1], [0], [0], [1], [0, 0, 1, 1], [], []>} : vector<16x128xbf16>, vector<128x128xbf16>, vector<16x128xf32> -> vector<16x128xf32>
    %13 = vector.broadcast %10 : vector<1x128xf32> to vector<16x128xf32>
    %14 = arith.addf %12, %13 : vector<16x128xf32>
    %cst_11 = arith.constant 0.000000e+00 : f32
    %15 = vector.broadcast %cst_11 : f32 to vector<16x128xf32>
    %16 = arith.maximumf %14, %15 : vector<16x128xf32>
    %c0_12 = arith.constant 0 : index
    %c0_13 = arith.constant 0 : index
    %17 = vector.load %arg6[%c0_12, %c0_13] : memref<128x32xbf16, #tpu.memory_space<vmem>>, vector<128x32xbf16>
    %c0_14 = arith.constant 0 : index
    %c0_15 = arith.constant 0 : index
    %18 = vector.load %arg7[%c0_14, %c0_15] : memref<1x32xf32, #tpu.memory_space<vmem>>, vector<1x32xf32>
    %19 = arith.truncf %16 : vector<16x128xf32> to vector<16x128xbf16>
    %cst_16 = arith.constant dense<0.000000e+00> : vector<16x32xf32>
    %20 = tpu.matmul %19, %17, %cst_16 {dimension_numbers = #tpu.dot_dimension_numbers<[1], [0], [0], [1], [0, 0, 1, 1], [], []>} : vector<16x128xbf16>, vector<128x32xbf16>, vector<16x32xf32> -> vector<16x32xf32>
    %21 = vector.broadcast %18 : vector<1x32xf32> to vector<16x32xf32>
    %22 = arith.addf %20, %21 : vector<16x32xf32>
    %c0_17 = arith.constant 0 : index
    %c0_18 = arith.constant 0 : index
    %23 = vector.load %arg8[%c0_17, %c0_18] : memref<16x32xf32, #tpu.memory_space<vmem>>, vector<16x32xf32>
    tpu.vector_store %arg8[%c0_17, %c0_18], %22 {strides = array<i32>} : memref<16x32xf32, #tpu.memory_space<vmem>>, vector<16x32xf32>,
    return
  }
  func.func @transform_0(%arg0: i32) -> (i32, i32) {
    %c0_i32 = arith.constant 0 : i32
    %c0_i32_0 = arith.constant 0 : i32
    return %arg0, %c0_i32 : i32, i32
  }
  func.func @transform_1(%arg0: i32) -> (i32, i32) {
    %c0_i32 = arith.constant 0 : i32
    %c0_i32_0 = arith.constant 0 : i32
    %c0_i32_1 = arith.constant 0 : i32
    return %c0_i32, %c0_i32_0 : i32, i32
  }
  func.func @transform_2(%arg0: i32) -> (i32, i32) {
    %c0_i32 = arith.constant 0 : i32
    %c0_i32_0 = arith.constant 0 : i32
    %c0_i32_1 = arith.constant 0 : i32
    return %c0_i32, %c0_i32_0 : i32, i32
  }
  func.func @transform_3(%arg0: i32) -> (i32, i32) {
    %c0_i32 = arith.constant 0 : i32
    %c0_i32_0 = arith.constant 0 : i32
    %c0_i32_1 = arith.constant 0 : i32
    return %c0_i32, %c0_i32_0 : i32, i32
  }
  func.func @transform_4(%arg0: i32) -> (i32, i32) {
    %c0_i32 = arith.constant 0 : i32
    %c0_i32_0 = arith.constant 0 : i32
    %c0_i32_1 = arith.constant 0 : i32
    return %c0_i32, %c0_i32_0 : i32, i32
  }
  func.func @transform_5(%arg0: i32) -> (i32, i32) {
    %c0_i32 = arith.constant 0 : i32
    %c0_i32_0 = arith.constant 0 : i32
    %c0_i32_1 = arith.constant 0 : i32
    return %c0_i32, %c0_i32_0 : i32, i32
  }
  func.func @transform_6(%arg0: i32) -> (i32, i32) {
    %c0_i32 = arith.constant 0 : i32
    %c0_i32_0 = arith.constant 0 : i32
    %c0_i32_1 = arith.constant 0 : i32
    return %c0_i32, %c0_i32_0 : i32, i32
  }
  func.func @transform_7(%arg0: i32) -> (i32, i32) {
    %c0_i32 = arith.constant 0 : i32
    %c0_i32_0 = arith.constant 0 : i32
    return %arg0, %c0_i32 : i32, i32
  }
}

module attributes {stable_mosaic.version = 11 : i64} {
  func.func @_fused_mlp_kernel(%arg0: i32, %arg1: memref<16x32xf32, #tpu.memory_space<vmem>>, %arg2: memref<32x128xbf16, #tpu.memory_space<vmem>>, %arg3: memref<1x128xf32, #tpu.memory_space<vmem>>, %arg4: memref<128x128xbf16, #tpu.memory_space<vmem>>, %arg5: memref<1x128xf32, #tpu.memory_space<vmem>>, %arg6: memref<128x32xbf16, #tpu.memory_space<vmem>>, %arg7: memref<1x32xf32, #tpu.memory_space<vmem>>, %arg8: memref<16x32xf32, #tpu.memory_space<vmem>>) attributes {dimension_semantics = [#tpu.dimension_semantics<parallel>], iteration_bounds = array<i64: 1>, scalar_prefetch = 0 : i64, scratch_operands = 0 : i64, tpu.core_type = #tpu.core_type<tc>, window_params = [{transform_indices = @transform_0, window_bounds = array<i64: 16, 32>}, {pipeline_mode = #tpu.pipeline_mode<synchronous>, transform_indices = @transform_1, window_bounds = array<i64: 32, 128>}, {pipeline_mode = #tpu.pipeline_mode<synchronous>, transform_indices = @transform_2, window_bounds = array<i64: 1, 128>}, {pipeline_mode = #tpu.pipeline_mode<synchronous>, transform_indices = @transform_3, window_bounds = array<i64: 128, 128>}, {pipeline_mode = #tpu.pipeline_mode<synchronous>, transform_indices = @transform_4, window_bounds = array<i64: 1, 128>}, {pipeline_mode = #tpu.pipeline_mode<synchronous>, transform_indices = @transform_5, window_bounds = array<i64: 128, 32>}, {pipeline_mode = #tpu.pipeline_mode<synchronous>, transform_indices = @transform_6, window_bounds = array<i64: 1, 32>}, {transform_indices = @transform_7, window_bounds = array<i64: 16, 32>}]} {
    %c0 = arith.constant 0 : index
    %c0_0 = arith.constant 0 : index
    %0 = vector.load %arg1[%c0, %c0_0] : memref<16x32xf32, #tpu.memory_space<vmem>>, vector<16x32xf32>
    %c0_1 = arith.constant 0 : index
    %c0_2 = arith.constant 0 : index
    %1 = vector.load %arg2[%c0_1, %c0_2] : memref<32x128xbf16, #tpu.memory_space<vmem>>, vector<32x128xbf16>
    %c0_3 = arith.constant 0 : index
    %c0_4 = arith.constant 0 : index
    %2 = vector.load %arg3[%c0_3, %c0_4] : memref<1x128xf32, #tpu.memory_space<vmem>>, vector<1x128xf32>
    %3 = arith.truncf %0 : vector<16x32xf32> to vector<16x32xbf16>
    %cst = arith.constant dense<0.000000e+00> : vector<16x128xf32>
    %4 = tpu.matmul %3, %1, %cst {dimension_numbers = #tpu.dot_dimension_numbers<[1], [0], [0], [1], [0, 0, 1, 1], [], []>} : vector<16x32xbf16>, vector<32x128xbf16>, vector<16x128xf32> -> vector<16x128xf32>
    %5 = vector.broadcast %2 : vector<1x128xf32> to vector<16x128xf32>
    %6 = arith.addf %4, %5 : vector<16x128xf32>
    %cst_5 = arith.constant 0.000000e+00 : f32
    %7 = vector.broadcast %cst_5 : f32 to vector<16x128xf32>
    %8 = arith.maximumf %6, %7 : vector<16x128xf32>
    %c0_6 = arith.constant 0 : index
    %c0_7 = arith.constant 0 : index
    %9 = vector.load %arg4[%c0_6, %c0_7] : memref<128x128xbf16, #tpu.memory_space<vmem>>, vector<128x128xbf16>
    %c0_8 = arith.constant 0 : index
    %c0_9 = arith.constant 0 : index
    %10 = vector.load %arg5[%c0_8, %c0_9] : memref<1x128xf32, #tpu.memory_space<vmem>>, vector<1x128xf32>
    %11 = arith.truncf %8 : vector<16x128xf32> to vector<16x128xbf16>
    %cst_10 = arith.constant dense<0.000000e+00> : vector<16x128xf32>
    %12 = tpu.matmul %11, %9, %cst_10 {dimension_numbers = #tpu.dot_dimension_numbers<[1], [0], [0], [1], [0, 0, 1, 1], [], []>} : vector<16x128xbf16>, vector<128x128xbf16>, vector<16x128xf32> -> vector<16x128xf32>
    %13 = vector.broadcast %10 : vector<1x128xf32> to vector<16x128xf32>
    %14 = arith.addf %12, %13 : vector<16x128xf32>
    %cst_11 = arith.constant 0.000000e+00 : f32
    %15 = vector.broadcast %cst_11 : f32 to vector<16x128xf32>
    %16 = arith.maximumf %14, %15 : vector<16x128xf32>
    %c0_12 = arith.constant 0 : index
    %c0_13 = arith.constant 0 : index
    %17 = vector.load %arg6[%c0_12, %c0_13] : memref<128x32xbf16, #tpu.memory_space<vmem>>, vector<128x32xbf16>
    %c0_14 = arith.constant 0 : index
    %c0_15 = arith.constant 0 : index
    %18 = vector.load %arg7[%c0_14, %c0_15] : memref<1x32xf32, #tpu.memory_space<vmem>>, vector<1x32xf32>
    %19 = arith.truncf %16 : vector<16x128xf32> to vector<16x128xbf16>
    %cst_16 = arith.constant dense<0.000000e+00> : vector<16x32xf32>
    %20 = tpu.matmul %19, %17, %cst_16 {dimension_numbers = #tpu.dot_dimension_numbers<[1], [0], [0], [1], [0, 0, 1, 1], [], []>} : vector<16x128xbf16>, vector<128x32xbf16>, vector<16x32xf32> -> vector<16x32xf32>
    %21 = vector.broadcast %18 : vector<1x32xf32> to vector<16x32xf32>
    %22 = arith.addf %20, %21 : vector<16x32xf32>
    %c0_17 = arith.constant 0 : index
    %c0_18 = arith.constant 0 : index
    %23 = vector.load %arg8[%c0_17, %c0_18] : memref<16x32xf32, #tpu.memory_space<vmem>>, vector<16x32xf32>
    tpu.vector_store %arg8[%c0_17, %c0_18], %22 {strides = array<i32>} : memref<16x32xf32, #tpu.memory_space<vmem>>, vector<16x32xf32>,
    return
  }
  func.func @transform_0(%arg0: i32) -> (i32, i32) {
    %c0_i32 = arith.constant 0 : i32
    %c0_i32_0 = arith.constant 0 : i32
    return %arg0, %c0_i32 : i32, i32
  }
  func.func @transform_1(%arg0: i32) -> (i32, i32) {
    %c0_i32 = arith.constant 0 : i32
    %c0_i32_0 = arith.constant 0 : i32
    %c0_i32_1 = arith.constant 0 : i32
    return %c0_i32, %c0_i32_0 : i32, i32
  }
  func.func @transform_2(%arg0: i32) -> (i32, i32) {
    %c0_i32 = arith.constant 0 : i32
    %c0_i32_0 = arith.constant 0 : i32
    %c0_i32_1 = arith.constant 0 : i32
    return %c0_i32, %c0_i32_0 : i32, i32
  }
  func.func @transform_3(%arg0: i32) -> (i32, i32) {
    %c0_i32 = arith.constant 0 : i32
    %c0_i32_0 = arith.constant 0 : i32
    %c0_i32_1 = arith.constant 0 : i32
    return %c0_i32, %c0_i32_0 : i32, i32
  }
  func.func @transform_4(%arg0: i32) -> (i32, i32) {
    %c0_i32 = arith.constant 0 : i32
    %c0_i32_0 = arith.constant 0 : i32
    %c0_i32_1 = arith.constant 0 : i32
    return %c0_i32, %c0_i32_0 : i32, i32
  }
  func.func @transform_5(%arg0: i32) -> (i32, i32) {
    %c0_i32 = arith.constant 0 : i32
    %c0_i32_0 = arith.constant 0 : i32
    %c0_i32_1 = arith.constant 0 : i32
    return %c0_i32, %c0_i32_0 : i32, i32
  }
  func.func @transform_6(%arg0: i32) -> (i32, i32) {
    %c0_i32 = arith.constant 0 : i32
    %c0_i32_0 = arith.constant 0 : i32
    %c0_i32_1 = arith.constant 0 : i32
    return %c0_i32, %c0_i32_0 : i32, i32
  }
  func.func @transform_7(%arg0: i32) -> (i32, i32) {
    %c0_i32 = arith.constant 0 : i32
    %c0_i32_0 = arith.constant 0 : i32
    return %arg0, %c0_i32 : i32, i32
  }
}

</mosaic_0001>

<bundles_post_ra>
// kernel: tpu_custom_call.1
= control target key start
LH: loop header
LB: loop body
LE: loop exit
PB: predicated region body
PF: predicated region fallthrough
CT: control target
= control target key end

     0   :  { %12 = vsyncpa [#allocation3], 0  ;;  %s689_s0 = inlined_call_operand.vmem [shape: f32[16,32], index: 0, kind: input, shape index: {}]   ;;  %s690_s1 = inlined_call_operand.hbm [shape: bf16[32,128], index: 1, kind: input, shape index: {}]   ;;  %s691_s2 = inlined_call_operand.vmem [shape: f32[1,128], index: 2, kind: input, shape index: {}]   ;;  %s692_s3 = inlined_call_operand.vmem [shape: bf16[128,128], index: 3, kind: input, shape index: {}]   ;;  %s693_s4 = inlined_call_operand.vmem [shape: f32[1,128], index: 4, kind: input, shape index: {}]   ;;  %s694_s5 = inlined_call_operand.vmem [shape: bf16[128,32], index: 5, kind: input, shape index: {}]   ;;  %s695_s6 = inlined_call_operand.vmem [shape: f32[1,32], index: 6, kind: input, shape index: {}]   ;;  %s696_s7 = inlined_call_operand.hbm [shape: f32[16,32], index: 7, kind: output, shape index: {}]  }
   0x1   :  { %13 = vsyncpa [#allocation4], 0  ;;  %s527_s24 = smov [#allocation2]   ;;  %s479_s28 = scalar_lea.hbm %s690_s1, 256 }
   0x2   :  { %s21_s25 = sshll.u32 %s527_s24, 4  ;;  %p480_p0 = scmp.ne.s32.totalorder %s690_s1, %s479_s28  ;;  %s22_s25 = int_to_ptr.vmem [resolvable:$true] %s21_s25 }
   0x3   :  { %p483_p1 = scmp.lt.u32.totalorder %s479_s28, %s690_s1 }
   0x5   :  { %p485_p2 = pnand %p483_p1, %p480_p0 }
   0x7   :  { %488 = shalt.err (!%p485_p2)
}
   0x8   :  { %s489_s10 = scalar_lea.vmem %s22_s25, 256  ;;  %p494_p4 = scmp.lt.s32.totalorder %s22_s25, %s22_s25 }
   0x9   :  { %p490_p3 = scmp.ne.s32.totalorder %s22_s25, %s489_s10  ;;  %p495_p5 = scmp.lt.s32.totalorder %s489_s10, %s489_s10 }
   0xb   :  { %p496_p6 = por %p495_p5, %p494_p4 }
   0xd   :  { %p497_p7 = pnand %p496_p6, %p490_p3 }
   0xf   :  { %500 = shalt.err (!%p497_p7)
}
  0x10   :  { %s528_s11 = smov 64   ;;  %s529_s12 = smov 4  }
  0x11   :  { %27 = dma.hbm_to_vmem [thread:$0]  %s690_s1, 256, %s22_s25, [#allocation3], %s528_s11, %s528_s11, %s529_s12  }
  0x12   :  { %523 = dma.done.wait [#allocation3], 256  }
  0x13   :  { %524 = vsyncadd [#allocation3], 4294967040  ;;  %v530_v0 = vmov 0.0   ;;  %vm531_vm0 = vmmov 0   ;;  %v461_v1 = vld [vmem:[#allocation2] sm:$0xff]   ;;  %v462_v2 = vld [vmem:[#allocation2 + $0x8] sm:$0xff]  }
  0x14   :  { %405 = vmatprep.subr.bf16.mxu0 %v530_v0  ;;  %409 = vmatprep.mubr.msk.bf16.mxu0 %vm531_vm0, %v530_v0  ;;  %v42_v3 = vld [vmem:[%s689_s0] sm:$0xff]  ;;  %v43_v4 = vld [vmem:[%s689_s0 + $0x8] sm:$0xff]  ;;  %vm68_vm1 = vcmask 261120   ;;  %v465_v8 = vld [vmem:[%s692_s3 + $0x10] sm:$0xff]  }
  0x15   :  { %413 = vmatprep.subr.bf16.mxu1 %v530_v0  ;;  %429 = vmatprep.mubr.msk.bf16.mxu1 %vm531_vm0, %v530_v0  ;;  %v463_v5 = vld [vmem:[%s692_s3] sm:$0xff]   ;;  %v49_v6 = vpack.c.bf16 %v43_v4, %v42_v3  ;;  %v464_v7 = vld [vmem:[%s692_s3 + $0x8] sm:$0xff]   ;;  %v466_v9 = vld [vmem:[%s692_s3 + $0x18] sm:$0xff]  }
  0x16   :  { %406 = vmatpush3.bf16.msra.mxu0 %v461_v1  ;;  %414 = vmatpush3.bf16.msra.mxu1 %v463_v5  ;;  %v467_v10 = vld [vmem:[%s692_s3 + $0x20] sm:$0xff]   ;;  %v468_v11 = vld [vmem:[%s692_s3 + $0x28] sm:$0xff]   ;;  %v469_v12 = vld [vmem:[%s692_s3 + $0x30] sm:$0xff]  }
  0x17   :  { %407 = vmatprep.subr.bf16.mxu0 %v530_v0  ;;  %415 = vmatprep.subr.bf16.mxu1 %v530_v0  ;;  %v470_v13 = vld [vmem:[%s692_s3 + $0x38] sm:$0xff]   ;;  %v471_v14 = vld [vmem:[%s694_s5] sm:$0xff]   ;;  %v472_v15 = vld [vmem:[%s694_s5 + $0x8] sm:$0xff]  }
  0x18   :  { %v473_v16 = vld [vmem:[%s694_s5 + $0x10] sm:$0xff]   ;;  %v474_v17 = vld [vmem:[%s694_s5 + $0x18] sm:$0xff]   ;;  %v475_v18 = vld [vmem:[%s694_s5 + $0x20] sm:$0xff]  }
  0x19   :  { %v476_v19 = vld [vmem:[%s694_s5 + $0x28] sm:$0xff]   ;;  %v362_v20 = vld [vmem:[%s691_s2] ss:$0 sm:$0xff]  ;;  %v477_v30 = vld [vmem:[%s694_s5 + $0x30] sm:$0xff]  }
  0x1a   :  { %408 = vmatpush3.bf16.msra.mxu0 %v462_v2  ;;  %416 = vmatpush3.bf16.msra.mxu1 %v464_v7  ;;  %v478_v31 = vld [vmem:[%s694_s5 + $0x38] sm:$0xff]   ;;  %v366_v32 = vld [vmem:[%s693_s4] ss:$0 sm:$0xff]  ;;  %s532_s5 = smov [#allocation5]  }
  0x1b   :  { %433 = vmatprep.subr.bf16.mxu0 %v530_v0  ;;  %417 = vmatprep.subr.bf16.mxu1 %v530_v0  ;;  %v375_v42 = vld [vmem:[%s695_s6] ss:$0 sm:$0xff]  ;;  %s350_s28 = sshll.u32 %s532_s5, 4  ;;  %s351_s28 = int_to_ptr.vmem [resolvable:$true] %s350_s28 }
  0x1c   :  { %s501_s4 = scalar_lea.vmem %s351_s28, 256  ;;  %p506_p9 = scmp.lt.s32.totalorder %s351_s28, %s351_s28 }
  0x1d   :  { %410 = vmatmul.mubr.msk.bf16.vlgmr.msra.gmra.mrb[0].mxu0 %vm68_vm1, %v49_v6  ;;  %p502_p8 = scmp.ne.s32.totalorder %s351_s28, %s501_s4  ;;  %p507_p10 = scmp.lt.s32.totalorder %s501_s4, %s501_s4 }
  0x1e   :  { %449 = vmatprep.mubr.msk.bf16.mxu0 %vm531_vm0, %v530_v0  ;;  %418 = vmatpush3.bf16.msra.mxu1 %v465_v8 }
  0x1f   :  { %419 = vmatprep.subr.bf16.mxu1 %v530_v0  ;;  %434 = vmatpush3.bf16.msra.mxu0 %v471_v14  ;;  %p508_p11 = por %p507_p10, %p506_p9 }
  0x20   :  { %435 = vmatprep.subr.bf16.mxu0 %v530_v0 }
  0x21   :  { %p509_p12 = pnand %p508_p11, %p502_p8 }
  0x22   :  { %420 = vmatpush3.bf16.msra.mxu1 %v466_v9 }
  0x23   :  { %421 = vmatprep.subr.bf16.mxu1 %v530_v0  ;;  %436 = vmatpush3.bf16.msra.mxu0 %v472_v15 }
  0x24   :  { %437 = vmatprep.subr.bf16.mxu0 %v530_v0 }
  0x26   :  { %422 = vmatpush3.bf16.msra.mxu1 %v467_v10 }
  0x27   :  { %423 = vmatprep.subr.bf16.mxu1 %v530_v0  ;;  %438 = vmatpush3.bf16.msra.mxu0 %v473_v16 }
  0x28   :  { %439 = vmatprep.subr.bf16.mxu0 %v530_v0 }
  0x2a   :  { %424 = vmatpush3.bf16.msra.mxu1 %v468_v11 }
  0x2b   :  { %425 = vmatprep.subr.bf16.mxu1 %v530_v0  ;;  %440 = vmatpush3.bf16.msra.mxu0 %v474_v17 }
  0x2c   :  { %441 = vmatprep.subr.bf16.mxu0 %v530_v0 }
  0x2e   :  { %426 = vmatpush3.bf16.msra.mxu1 %v469_v12 }
  0x2f   :  { %427 = vmatprep.subr.bf16.mxu1 %v530_v0  ;;  %442 = vmatpush3.bf16.msra.mxu0 %v475_v18 }
  0x30   :  { %443 = vmatprep.subr.bf16.mxu0 %v530_v0 }
  0x32   :  { %428 = vmatpush3.bf16.msra.mxu1 %v470_v13 }
  0x33   :  { %444 = vmatpush3.bf16.msra.mxu0 %v476_v19 }
  0x34   :  { %445 = vmatprep.subr.bf16.mxu0 %v530_v0 }
  0x37   :  { %446 = vmatpush3.bf16.msra.mxu0 %v477_v30 }
  0x38   :  { %447 = vmatprep.subr.bf16.mxu0 %v530_v0 }
  0x3b   :  { %448 = vmatpush3.bf16.msra.mxu0 %v478_v31 }
  0xf0   :  { %v106_v21 = vpop.f32.mrb[0].mxu0 }
  0xf1   :  { %v107_v22 = vadd.f32 %v362_v20, %v106_v21  ;;  %v411_v23 = vpop.f32.mrb[1].mxu0 }
  0xf2   :  { %v109_v24 = vpop.f32.mrb[2].mxu0 }
  0xf3   :  { %v110_v25 = vadd.f32 %v362_v20, %v109_v24  ;;  %v412_v26 = vpop.f32.mrb[3].mxu0  ;;  %v113_v27 = vmax.f32 %v107_v22, 0.0 }
  0xf5   :  { %v114_v28 = vmax.f32 %v110_v25, 0.0 }
  0xf7   :  { %v132_v29 = vpack.c.bf16 %v114_v28, %v113_v27 }
  0xf9   :  { %430 = vmatmul.mubr.bf16.vlgmr.msra.gmra.mrb[0].mxu1 %v132_v29 }
 0x1cc   :  { %v221_v33 = vpop.f32.mrb[0].mxu1 }
 0x1cd   :  { %v222_v34 = vadd.f32 %v366_v32, %v221_v33  ;;  %v431_v35 = vpop.f32.mrb[1].mxu1 }
 0x1ce   :  { %v224_v36 = vpop.f32.mrb[2].mxu1 }
 0x1cf   :  { %v225_v37 = vadd.f32 %v366_v32, %v224_v36  ;;  %v432_v38 = vpop.f32.mrb[3].mxu1  ;;  %v228_v39 = vmax.f32 %v222_v34, 0.0 }
 0x1d1   :  { %v229_v40 = vmax.f32 %v225_v37, 0.0 }
 0x1d3   :  { %v247_v41 = vpack.c.bf16 %v229_v40, %v228_v39 }
 0x1d5   :  { %450 = vmatmul.mubr.bf16.vlgmr.msra.gmra.mrb[4].mxu0 %v247_v41 }
 0x2a8   :  { %v336_v43 = vpop.f32.mrb[4].mxu0 }
 0x2a9   :  { %v337_v44 = vadd.f32 %v375_v42, %v336_v43  ;;  %v451_v45 = vpop.f32.mrb[5].mxu0 }
 0x2aa   :  { %v339_v46 = vpop.f32.mrb[6].mxu0 }
 0x2ab   :  { %343 = vst.msk [vmem:[#allocation5] sm:$0xff] %vm68_vm1, %v337_v44  ;;  %v340_v47 = vadd.f32 %v375_v42, %v339_v46  ;;  %v452_v48 = vpop.f32.mrb[7].mxu0 }
 0x2ad   :  { %344 = vst.msk [vmem:[#allocation5 + $0x8] sm:$0xff] %vm68_vm1, %v340_v47 }
 0x2ae   :  { %512 = shalt.err (!%p509_p12)
}
 0x2af   :  { %s513_s30 = scalar_lea.hbm %s696_s7, 256 }
 0x2b0   :  { %p514_p13 = scmp.ne.s32.totalorder %s696_s7, %s513_s30  ;;  %p517_p0 = scmp.lt.u32.totalorder %s513_s30, %s696_s7 }
 0x2b2   :  { %p519_p1 = pnand %p517_p0, %p514_p13 }
 0x2b4   :  { %522 = shalt.err (!%p519_p1)
}
 0x2b5   :  { %s533_s12 = smov 128   ;;  %s534_s13 = smov 8  }
 0x2b6   :  { %356 = dma.vmem_to_hbm [thread:$0]  %s351_s28, 256, %s696_s7, [#allocation4], %s533_s12, %s533_s12, %s534_s13  }
 0x2b7   :  { %525 = dma.done.wait [#allocation4], 256  }
 0x2b8   :  { %526 = vsyncadd [#allocation4], 4294967040 }
 0x2b9   :  { %360 = vsyncpa [#allocation3], 1 }
 0x2ba   :  { %361 = vsyncpa [#allocation4], 1 }

// kernel: tpu_custom_call.1
= control target key start
LH: loop header
LB: loop body
LE: loop exit
PB: predicated region body
PF: predicated region fallthrough
CT: control target
= control target key end

     0   :  { %12 = vsyncpa [#allocation3], 0  ;;  %s689_s0 = inlined_call_operand.vmem [shape: f32[16,32], index: 0, kind: input, shape index: {}]   ;;  %s690_s1 = inlined_call_operand.hbm [shape: bf16[32,128], index: 1, kind: input, shape index: {}]   ;;  %s691_s2 = inlined_call_operand.vmem [shape: f32[1,128], index: 2, kind: input, shape index: {}]   ;;  %s692_s3 = inlined_call_operand.vmem [shape: bf16[128,128], index: 3, kind: input, shape index: {}]   ;;  %s693_s4 = inlined_call_operand.vmem [shape: f32[1,128], index: 4, kind: input, shape index: {}]   ;;  %s694_s5 = inlined_call_operand.vmem [shape: bf16[128,32], index: 5, kind: input, shape index: {}]   ;;  %s695_s6 = inlined_call_operand.vmem [shape: f32[1,32], index: 6, kind: input, shape index: {}]   ;;  %s696_s7 = inlined_call_operand.hbm [shape: f32[16,32], index: 7, kind: output, shape index: {}]  }
   0x1   :  { %13 = vsyncpa [#allocation4], 0  ;;  %s527_s24 = smov [#allocation2]   ;;  %s479_s28 = scalar_lea.hbm %s690_s1, 256 }
   0x2   :  { %s21_s25 = sshll.u32 %s527_s24, 4  ;;  %p480_p0 = scmp.ne.s32.totalorder %s690_s1, %s479_s28  ;;  %s22_s25 = int_to_ptr.vmem [resolvable:$true] %s21_s25 }
   0x3   :  { %p483_p1 = scmp.lt.u32.totalorder %s479_s28, %s690_s1 }
   0x5   :  { %p485_p2 = pnand %p483_p1, %p480_p0 }
   0x7   :  { %488 = shalt.err (!%p485_p2)
}
   0x8   :  { %s489_s10 = scalar_lea.vmem %s22_s25, 256  ;;  %p494_p4 = scmp.lt.s32.totalorder %s22_s25, %s22_s25 }
   0x9   :  { %p490_p3 = scmp.ne.s32.totalorder %s22_s25, %s489_s10  ;;  %p495_p5 = scmp.lt.s32.totalorder %s489_s10, %s489_s10 }
   0xb   :  { %p496_p6 = por %p495_p5, %p494_p4 }
   0xd   :  { %p497_p7 = pnand %p496_p6, %p490_p3 }
   0xf   :  { %500 = shalt.err (!%p497_p7)
}
  0x10   :  { %s528_s11 = smov 64   ;;  %s529_s12 = smov 4  }
  0x11   :  { %27 = dma.hbm_to_vmem [thread:$0]  %s690_s1, 256, %s22_s25, [#allocation3], %s528_s11, %s528_s11, %s529_s12  }
  0x12   :  { %523 = dma.done.wait [#allocation3], 256  }
  0x13   :  { %524 = vsyncadd [#allocation3], 4294967040  ;;  %v530_v0 = vmov 0.0   ;;  %vm531_vm0 = vmmov 0   ;;  %v461_v1 = vld [vmem:[#allocation2] sm:$0xff]   ;;  %v462_v2 = vld [vmem:[#allocation2 + $0x8] sm:$0xff]  }
  0x14   :  { %405 = vmatprep.subr.bf16.mxu0 %v530_v0  ;;  %409 = vmatprep.mubr.msk.bf16.mxu0 %vm531_vm0, %v530_v0  ;;  %v42_v3 = vld [vmem:[%s689_s0] sm:$0xff]  ;;  %v43_v4 = vld [vmem:[%s689_s0 + $0x8] sm:$0xff]  ;;  %vm68_vm1 = vcmask 261120   ;;  %v465_v8 = vld [vmem:[%s692_s3 + $0x10] sm:$0xff]  }
  0x15   :  { %413 = vmatprep.subr.bf16.mxu1 %v530_v0  ;;  %429 = vmatprep.mubr.msk.bf16.mxu1 %vm531_vm0, %v530_v0  ;;  %v463_v5 = vld [vmem:[%s692_s3] sm:$0xff]   ;;  %v49_v6 = vpack.c.bf16 %v43_v4, %v42_v3  ;;  %v464_v7 = vld [vmem:[%s692_s3 + $0x8] sm:$0xff]   ;;  %v466_v9 = vld [vmem:[%s692_s3 + $0x18] sm:$0xff]  }
  0x16   :  { %406 = vmatpush3.bf16.msra.mxu0 %v461_v1  ;;  %414 = vmatpush3.bf16.msra.mxu1 %v463_v5  ;;  %v467_v10 = vld [vmem:[%s692_s3 + $0x20] sm:$0xff]   ;;  %v468_v11 = vld [vmem:[%s692_s3 + $0x28] sm:$0xff]   ;;  %v469_v12 = vld [vmem:[%s692_s3 + $0x30] sm:$0xff]  }
  0x17   :  { %407 = vmatprep.subr.bf16.mxu0 %v530_v0  ;;  %415 = vmatprep.subr.bf16.mxu1 %v530_v0  ;;  %v470_v13 = vld [vmem:[%s692_s3 + $0x38] sm:$0xff]   ;;  %v471_v14 = vld [vmem:[%s694_s5] sm:$0xff]   ;;  %v472_v15 = vld [vmem:[%s694_s5 + $0x8] sm:$0xff]  }
  0x18   :  { %v473_v16 = vld [vmem:[%s694_s5 + $0x10] sm:$0xff]   ;;  %v474_v17 = vld [vmem:[%s694_s5 + $0x18] sm:$0xff]   ;;  %v475_v18 = vld [vmem:[%s694_s5 + $0x20] sm:$0xff]  }
  0x19   :  { %v476_v19 = vld [vmem:[%s694_s5 + $0x28] sm:$0xff]   ;;  %v362_v20 = vld [vmem:[%s691_s2] ss:$0 sm:$0xff]  ;;  %v477_v30 = vld [vmem:[%s694_s5 + $0x30] sm:$0xff]  }
  0x1a   :  { %408 = vmatpush3.bf16.msra.mxu0 %v462_v2  ;;  %416 = vmatpush3.bf16.msra.mxu1 %v464_v7  ;;  %v478_v31 = vld [vmem:[%s694_s5 + $0x38] sm:$0xff]   ;;  %v366_v32 = vld [vmem:[%s693_s4] ss:$0 sm:$0xff]  ;;  %s532_s5 = smov [#allocation5]  }
  0x1b   :  { %433 = vmatprep.subr.bf16.mxu0 %v530_v0  ;;  %417 = vmatprep.subr.bf16.mxu1 %v530_v0  ;;  %v375_v42 = vld [vmem:[%s695_s6] ss:$0 sm:$0xff]  ;;  %s350_s28 = sshll.u32 %s532_s5, 4  ;;  %s351_s28 = int_to_ptr.vmem [resolvable:$true] %s350_s28 }
  0x1c   :  { %s501_s4 = scalar_lea.vmem %s351_s28, 256  ;;  %p506_p9 = scmp.lt.s32.totalorder %s351_s28, %s351_s28 }
  0x1d   :  { %410 = vmatmul.mubr.msk.bf16.vlgmr.msra.gmra.mrb[0].mxu0 %vm68_vm1, %v49_v6  ;;  %p502_p8 = scmp.ne.s32.totalorder %s351_s28, %s501_s4  ;;  %p507_p10 = scmp.lt.s32.totalorder %s501_s4, %s501_s4 }
  0x1e   :  { %449 = vmatprep.mubr.msk.bf16.mxu0 %vm531_vm0, %v530_v0  ;;  %418 = vmatpush3.bf16.msra.mxu1 %v465_v8 }
  0x1f   :  { %419 = vmatprep.subr.bf16.mxu1 %v530_v0  ;;  %434 = vmatpush3.bf16.msra.mxu0 %v471_v14  ;;  %p508_p11 = por %p507_p10, %p506_p9 }
  0x20   :  { %435 = vmatprep.subr.bf16.mxu0 %v530_v0 }
  0x21   :  { %p509_p12 = pnand %p508_p11, %p502_p8 }
  0x22   :  { %420 = vmatpush3.bf16.msra.mxu1 %v466_v9 }
  0x23   :  { %421 = vmatprep.subr.bf16.mxu1 %v530_v0  ;;  %436 = vmatpush3.bf16.msra.mxu0 %v472_v15 }
  0x24   :  { %437 = vmatprep.subr.bf16.mxu0 %v530_v0 }
  0x26   :  { %422 = vmatpush3.bf16.msra.mxu1 %v467_v10 }
  0x27   :  { %423 = vmatprep.subr.bf16.mxu1 %v530_v0  ;;  %438 = vmatpush3.bf16.msra.mxu0 %v473_v16 }
  0x28   :  { %439 = vmatprep.subr.bf16.mxu0 %v530_v0 }
  0x2a   :  { %424 = vmatpush3.bf16.msra.mxu1 %v468_v11 }
  0x2b   :  { %425 = vmatprep.subr.bf16.mxu1 %v530_v0  ;;  %440 = vmatpush3.bf16.msra.mxu0 %v474_v17 }
  0x2c   :  { %441 = vmatprep.subr.bf16.mxu0 %v530_v0 }
  0x2e   :  { %426 = vmatpush3.bf16.msra.mxu1 %v469_v12 }
  0x2f   :  { %427 = vmatprep.subr.bf16.mxu1 %v530_v0  ;;  %442 = vmatpush3.bf16.msra.mxu0 %v475_v18 }
  0x30   :  { %443 = vmatprep.subr.bf16.mxu0 %v530_v0 }
  0x32   :  { %428 = vmatpush3.bf16.msra.mxu1 %v470_v13 }
  0x33   :  { %444 = vmatpush3.bf16.msra.mxu0 %v476_v19 }
  0x34   :  { %445 = vmatprep.subr.bf16.mxu0 %v530_v0 }
  0x37   :  { %446 = vmatpush3.bf16.msra.mxu0 %v477_v30 }
  0x38   :  { %447 = vmatprep.subr.bf16.mxu0 %v530_v0 }
  0x3b   :  { %448 = vmatpush3.bf16.msra.mxu0 %v478_v31 }
  0xf0   :  { %v106_v21 = vpop.f32.mrb[0].mxu0 }
  0xf1   :  { %v107_v22 = vadd.f32 %v362_v20, %v106_v21  ;;  %v411_v23 = vpop.f32.mrb[1].mxu0 }
  0xf2   :  { %v109_v24 = vpop.f32.mrb[2].mxu0 }
  0xf3   :  { %v110_v25 = vadd.f32 %v362_v20, %v109_v24  ;;  %v412_v26 = vpop.f32.mrb[3].mxu0  ;;  %v113_v27 = vmax.f32 %v107_v22, 0.0 }
  0xf5   :  { %v114_v28 = vmax.f32 %v110_v25, 0.0 }
  0xf7   :  { %v132_v29 = vpack.c.bf16 %v114_v28, %v113_v27 }
  0xf9   :  { %430 = vmatmul.mubr.bf16.vlgmr.msra.gmra.mrb[0].mxu1 %v132_v29 }
 0x1cc   :  { %v221_v33 = vpop.f32.mrb[0].mxu1 }
 0x1cd   :  { %v222_v34 = vadd.f32 %v366_v32, %v221_v33  ;;  %v431_v35 = vpop.f32.mrb[1].mxu1 }
 0x1ce   :  { %v224_v36 = vpop.f32.mrb[2].mxu1 }
 0x1cf   :  { %v225_v37 = vadd.f32 %v366_v32, %v224_v36  ;;  %v432_v38 = vpop.f32.mrb[3].mxu1  ;;  %v228_v39 = vmax.f32 %v222_v34, 0.0 }
 0x1d1   :  { %v229_v40 = vmax.f32 %v225_v37, 0.0 }
 0x1d3   :  { %v247_v41 = vpack.c.bf16 %v229_v40, %v228_v39 }
 0x1d5   :  { %450 = vmatmul.mubr.bf16.vlgmr.msra.gmra.mrb[4].mxu0 %v247_v41 }
 0x2a8   :  { %v336_v43 = vpop.f32.mrb[4].mxu0 }
 0x2a9   :  { %v337_v44 = vadd.f32 %v375_v42, %v336_v43  ;;  %v451_v45 = vpop.f32.mrb[5].mxu0 }
 0x2aa   :  { %v339_v46 = vpop.f32.mrb[6].mxu0 }
 0x2ab   :  { %343 = vst.msk [vmem:[#allocation5] sm:$0xff] %vm68_vm1, %v337_v44  ;;  %v340_v47 = vadd.f32 %v375_v42, %v339_v46  ;;  %v452_v48 = vpop.f32.mrb[7].mxu0 }
 0x2ad   :  { %344 = vst.msk [vmem:[#allocation5 + $0x8] sm:$0xff] %vm68_vm1, %v340_v47 }
 0x2ae   :  { %512 = shalt.err (!%p509_p12)
}
 0x2af   :  { %s513_s30 = scalar_lea.hbm %s696_s7, 256 }
 0x2b0   :  { %p514_p13 = scmp.ne.s32.totalorder %s696_s7, %s513_s30  ;;  %p517_p0 = scmp.lt.u32.totalorder %s513_s30, %s696_s7 }
 0x2b2   :  { %p519_p1 = pnand %p517_p0, %p514_p13 }
 0x2b4   :  { %522 = shalt.err (!%p519_p1)
}
 0x2b5   :  { %s533_s12 = smov 128   ;;  %s534_s13 = smov 8  }
 0x2b6   :  { %356 = dma.vmem_to_hbm [thread:$0]  %s351_s28, 256, %s696_s7, [#allocation4], %s533_s12, %s533_s12, %s534_s13  }
 0x2b7   :  { %525 = dma.done.wait [#allocation4], 256  }
 0x2b8   :  { %526 = vsyncadd [#allocation4], 4294967040 }
 0x2b9   :  { %360 = vsyncpa [#allocation3], 1 }
 0x2ba   :  { %361 = vsyncpa [#allocation4], 1 }

</bundles_post_ra>
